<compile_context>
chip_gen: v7x
topology: tpu7x:2x2x1
jax: 0.10.0
libtpu: 0.0.40
codegen_flags: <defaults>
</compile_context>

<pallas_src>
import functools

import jax
import jax.numpy as jnp
from jax.experimental import pallas as pl
from jax.experimental.pallas import tpu as pltpu

LANE = 128      # vreg lane width (last dim)
SUBLANE = 8     # vreg sublane width (second-to-last dim)


def _round_up(n, m):
    return pl.cdiv(n, m) * m


def _pad2d(a, rows, cols):
    r, c = a.shape
    return jnp.pad(a, ((0, rows - r), (0, cols - c)))


def _choose_tiling(batch, tile_b=None):
    """Pick (batch_p, tile_b, grid) with <=1 sublane-group of padding per tile."""
    batch_p8 = int(_round_up(batch, SUBLANE))
    if tile_b is None:
        target = 2048
        # Keep >= 2 grid steps for moderate/large batches so the parallel
        # batch axis can shard across v7x's two TensorCores.
        if batch_p8 > 2 * SUBLANE:
            target = min(target, int(_round_up(pl.cdiv(batch_p8, 2), SUBLANE)))
        tile_b = min(target, batch_p8)
    tile_b = max(SUBLANE, int(_round_up(int(tile_b), SUBLANE)))
    grid_b = int(pl.cdiv(batch_p8, tile_b))
    tile_b = int(_round_up(pl.cdiv(batch_p8, grid_b), SUBLANE))
    batch_p = tile_b * grid_b
    return batch_p, tile_b, grid_b


def prepare_params(w1, b1, w2, b2, w3, b3, *, use_bf16=False):
    """One-time (out of the hot path) padding / casting of the MLP params.

    w*: [in, out] (transpose of PyTorch nn.Linear weight); b*: [1, out].
    Hidden dims (fc1, fc2) are zero-padded to 128 lanes; the input dim and
    n_actions are left at their real sizes (their blocks use the full array
    dim, which is legal and keeps x / output HBM traffic at the real bytes).
    Padded lanes are exactly zero, so results on real lanes are unchanged.
    """
    in_dim, fc1 = w1.shape
    fc2 = w2.shape[1]
    h1_p = int(_round_up(fc1, LANE))
    h2_p = int(_round_up(fc2, LANE))

    wdt = jnp.bfloat16 if use_bf16 else jnp.float32
    w1p = _pad2d(w1, in_dim, h1_p).astype(wdt)
    b1p = _pad2d(b1, 1, h1_p).astype(jnp.float32)
    w2p = _pad2d(w2, h1_p, h2_p).astype(wdt)
    b2p = _pad2d(b2, 1, h2_p).astype(jnp.float32)
    w3p = _pad2d(w3, h2_p, w3.shape[1]).astype(wdt)
    b3p = b3.astype(jnp.float32)
    return w1p, b1p, w2p, b2p, w3p, b3p


def mlp_kernel(x_ref, w1_ref, b1_ref, w2_ref, b2_ref, w3_ref, b3_ref, o_ref):
    # One batch tile per grid step; weights/biases are VMEM-resident.
    w1 = w1_ref[...]
    w2 = w2_ref[...]
    w3 = w3_ref[...]
    wdt = w1.dtype  # f32 or bf16; activations are cast in-kernel (cheap VPU op)

    x = x_ref[...].astype(wdt)
    h1 = jnp.dot(x, w1, preferred_element_type=jnp.float32) + b1_ref[...]
    h1 = jnp.maximum(h1, 0.0)
    h2 = jnp.dot(h1.astype(wdt), w2, preferred_element_type=jnp.float32) + b2_ref[...]
    h2 = jnp.maximum(h2, 0.0)
    out = jnp.dot(h2.astype(wdt), w3, preferred_element_type=jnp.float32) + b3_ref[...]
    o_ref[...] = out.astype(o_ref.dtype)


@functools.partial(jax.jit, static_argnames=("tile_b",))
def generic_network_forward(x, w1p, b1p, w2p, b2p, w3p, b3p, *, tile_b=None):
    """x: [batch, in_dim]; params as produced by prepare_params()."""
    batch, in_dim = x.shape
    h1_p = w1p.shape[1]
    h2_p = w2p.shape[1]
    n_actions = w3p.shape[1]

    batch_p, tile_b, grid_b = _choose_tiling(batch, tile_b)

    # Only the batch (sublane) dim ever gets padded per call; lanes stay real.
    xp = x if batch_p == batch else jnp.pad(x, ((0, batch_p - batch), (0, 0)))

    flops = 2 * batch_p * (in_dim * h1_p + h1_p * h2_p + h2_p * n_actions)
    bytes_accessed = (
        xp.size * xp.dtype.itemsize
        + sum(int(a.size) * a.dtype.itemsize for a in (w1p, b1p, w2p, b2p, w3p, b3p))
        + batch_p * n_actions * 4
    )

    out_padded = pl.pallas_call(
        mlp_kernel,
        out_shape=jax.ShapeDtypeStruct((batch_p, n_actions), jnp.float32),
        grid=(grid_b,),
        in_specs=[
            # x tile: pipelined; last dim = real in_dim (full array dim -> legal).
            pl.BlockSpec((tile_b, in_dim), lambda i: (i, 0)),
            # Weights / biases: constant index_map -> stay resident in VMEM.
            pl.BlockSpec((in_dim, h1_p), lambda i: (0, 0)),
            pl.BlockSpec((1, h1_p), lambda i: (0, 0)),
            pl.BlockSpec((h1_p, h2_p), lambda i: (0, 0)),
            pl.BlockSpec((1, h2_p), lambda i: (0, 0)),
            pl.BlockSpec((h2_p, n_actions), lambda i: (0, 0)),
            pl.BlockSpec((1, n_actions), lambda i: (0, 0)),
        ],
        # Compact output: last dim = n_actions (full array dim) -> ~32x less
        # HBM writeback than a 128-lane padded slab.
        out_specs=pl.BlockSpec((tile_b, n_actions), lambda i: (i, 0)),
        compiler_params=pltpu.CompilerParams(
            dimension_semantics=("parallel",),
        ),
        cost_estimate=pl.CostEstimate(
            flops=flops, transcendentals=0, bytes_accessed=bytes_accessed),
    )(xp, w1p, b1p, w2p, b2p, w3p, b3p)

    return out_padded if batch_p == batch else out_padded[:batch]


def init_linear(key, fan_in, fan_out):
    # PyTorch nn.Linear default init: U(-1/sqrt(fan_in), 1/sqrt(fan_in)).
    kw, kb = jax.random.split(key)
    bound = 1.0 / jnp.sqrt(jnp.asarray(fan_in, jnp.float32))
    # stored as [in, out] (transposed vs PyTorch) so forward is x @ W
    w = jax.random.uniform(kw, (fan_in, fan_out), jnp.float32, -bound, bound)
    b = jax.random.uniform(kb, (1, fan_out), jnp.float32, -bound, bound)
    return w, b


def reference_forward(x, w1, b1, w2, b2, w3, b3):
    h1 = jnp.maximum(x @ w1 + b1, 0.0)
    h2 = jnp.maximum(h1 @ w2 + b2, 0.0)
    return h2 @ w3 + b3


if __name__ == "__main__":
    # GenericNetwork(alpha, input_dims=(8,), fc1_dims=32, fc2_dims=32, n_actions=4)
    # TODO(synk): the Adam optimizer / device plumbing in __init__ is training
    # infrastructure, not part of the forward pass, and is not translated.
    batch = 2
    input_dims = 8
    fc1_dims = 32
    fc2_dims = 32
    n_actions = 4

    key = jax.random.PRNGKey(0)
    k_x, k1, k2, k3 = jax.random.split(key, 4)

    x = jax.random.normal(k_x, (batch, input_dims), jnp.float32)
    w1, b1 = init_linear(k1, input_dims, fc1_dims)
    w2, b2 = init_linear(k2, fc1_dims, fc2_dims)
    w3, b3 = init_linear(k3, fc2_dims, n_actions)

    ref = reference_forward(x, w1, b1, w2, b2, w3, b3)

    # f32 path: bit-accurate vs the reference.
    params_f32 = prepare_params(w1, b1, w2, b2, w3, b3, use_bf16=False)
    out = jax.block_until_ready(generic_network_forward(x, *params_f32))
    assert out.shape == (batch, n_actions), out.shape
    assert jnp.allclose(out, ref, atol=1e-5, rtol=1e-5)

    # bf16 MXU-input path (native MXU rate on v5e/v6e/v7x): relaxed tolerance.
    params_bf16 = prepare_params(w1, b1, w2, b2, w3, b3, use_bf16=True)
    out_bf16 = jax.block_until_ready(generic_network_forward(x, *params_bf16))
    assert out_bf16.shape == (batch, n_actions), out_bf16.shape
    assert jnp.allclose(out_bf16, ref, atol=2e-2, rtol=2e-2)

    print("KERNEL_OK")
</pallas_src>

<mosaic_0001>
module attributes {stable_mosaic.version = 11 : i64} {
  func.func @mlp_kernel(%arg0: i32, %arg1: memref<8x8xf32, #tpu.memory_space<vmem>>, %arg2: memref<8x128xf32, #tpu.memory_space<vmem>>, %arg3: memref<1x128xf32, #tpu.memory_space<vmem>>, %arg4: memref<128x128xf32, #tpu.memory_space<vmem>>, %arg5: memref<1x128xf32, #tpu.memory_space<vmem>>, %arg6: memref<128x4xf32, #tpu.memory_space<vmem>>, %arg7: memref<1x4xf32, #tpu.memory_space<vmem>>, %arg8: memref<8x4xf32, #tpu.memory_space<vmem>>) attributes {dimension_semantics = [#tpu.dimension_semantics<parallel>], iteration_bounds = array<i64: 1>, scalar_prefetch = 0 : i64, scratch_operands = 0 : i64, tpu.core_type = #tpu.core_type<tc>, window_params = [{transform_indices = @transform_0, window_bounds = array<i64: 8, 8>}, {pipeline_mode = #tpu.pipeline_mode<synchronous>, transform_indices = @transform_1, window_bounds = array<i64: 8, 128>}, {pipeline_mode = #tpu.pipeline_mode<synchronous>, transform_indices = @transform_2, window_bounds = array<i64: 1, 128>}, {pipeline_mode = #tpu.pipeline_mode<synchronous>, transform_indices = @transform_3, window_bounds = array<i64: 128, 128>}, {pipeline_mode = #tpu.pipeline_mode<synchronous>, transform_indices = @transform_4, window_bounds = array<i64: 1, 128>}, {pipeline_mode = #tpu.pipeline_mode<synchronous>, transform_indices = @transform_5, window_bounds = array<i64: 128, 4>}, {pipeline_mode = #tpu.pipeline_mode<synchronous>, transform_indices = @transform_6, window_bounds = array<i64: 1, 4>}, {transform_indices = @transform_7, window_bounds = array<i64: 8, 4>}]} {
    %c0 = arith.constant 0 : index
    %c0_0 = arith.constant 0 : index
    %0 = vector.load %arg2[%c0, %c0_0] : memref<8x128xf32, #tpu.memory_space<vmem>>, vector<8x128xf32>
    %c0_1 = arith.constant 0 : index
    %c0_2 = arith.constant 0 : index
    %1 = vector.load %arg4[%c0_1, %c0_2] : memref<128x128xf32, #tpu.memory_space<vmem>>, vector<128x128xf32>
    %c0_3 = arith.constant 0 : index
    %c0_4 = arith.constant 0 : index
    %2 = vector.load %arg6[%c0_3, %c0_4] : memref<128x4xf32, #tpu.memory_space<vmem>>, vector<128x4xf32>
    %c0_5 = arith.constant 0 : index
    %c0_6 = arith.constant 0 : index
    %3 = vector.load %arg1[%c0_5, %c0_6] : memref<8x8xf32, #tpu.memory_space<vmem>>, vector<8x8xf32>
    %cst = arith.constant dense<0.000000e+00> : vector<8x128xf32>
    %4 = tpu.matmul %3, %0, %cst {dimension_numbers = #tpu.dot_dimension_numbers<[1], [0], [0], [1], [0, 0, 1, 1], [], []>} : vector<8x8xf32>, vector<8x128xf32>, vector<8x128xf32> -> vector<8x128xf32>
    %c0_7 = arith.constant 0 : index
    %c0_8 = arith.constant 0 : index
    %5 = vector.load %arg3[%c0_7, %c0_8] : memref<1x128xf32, #tpu.memory_space<vmem>>, vector<1x128xf32>
    %6 = vector.broadcast %5 : vector<1x128xf32> to vector<8x128xf32>
    %7 = arith.addf %4, %6 : vector<8x128xf32>
    %cst_9 = arith.constant 0.000000e+00 : f32
    %8 = vector.broadcast %cst_9 : f32 to vector<8x128xf32>
    %9 = arith.maximumf %7, %8 : vector<8x128xf32>
    %cst_10 = arith.constant dense<0.000000e+00> : vector<8x128xf32>
    %10 = tpu.matmul %9, %1, %cst_10 {dimension_numbers = #tpu.dot_dimension_numbers<[1], [0], [0], [1], [0, 0, 1, 1], [], []>} : vector<8x128xf32>, vector<128x128xf32>, vector<8x128xf32> -> vector<8x128xf32>
    %c0_11 = arith.constant 0 : index
    %c0_12 = arith.constant 0 : index
    %11 = vector.load %arg5[%c0_11, %c0_12] : memref<1x128xf32, #tpu.memory_space<vmem>>, vector<1x128xf32>
    %12 = vector.broadcast %11 : vector<1x128xf32> to vector<8x128xf32>
    %13 = arith.addf %10, %12 : vector<8x128xf32>
    %cst_13 = arith.constant 0.000000e+00 : f32
    %14 = vector.broadcast %cst_13 : f32 to vector<8x128xf32>
    %15 = arith.maximumf %13, %14 : vector<8x128xf32>
    %cst_14 = arith.constant dense<0.000000e+00> : vector<8x4xf32>
    %16 = tpu.matmul %15, %2, %cst_14 {dimension_numbers = #tpu.dot_dimension_numbers<[1], [0], [0], [1], [0, 0, 1, 1], [], []>} : vector<8x128xf32>, vector<128x4xf32>, vector<8x4xf32> -> vector<8x4xf32>
    %c0_15 = arith.constant 0 : index
    %c0_16 = arith.constant 0 : index
    %17 = vector.load %arg7[%c0_15, %c0_16] : memref<1x4xf32, #tpu.memory_space<vmem>>, vector<1x4xf32>
    %18 = vector.broadcast %17 : vector<1x4xf32> to vector<8x4xf32>
    %19 = arith.addf %16, %18 : vector<8x4xf32>
    %c0_17 = arith.constant 0 : index
    %c0_18 = arith.constant 0 : index
    %20 = vector.load %arg8[%c0_17, %c0_18] : memref<8x4xf32, #tpu.memory_space<vmem>>, vector<8x4xf32>
    tpu.vector_store %arg8[%c0_17, %c0_18], %19 {strides = array<i32>} : memref<8x4xf32, #tpu.memory_space<vmem>>, vector<8x4xf32>,
    return
  }
  func.func @transform_0(%arg0: i32) -> (i32, i32) {
    %c0_i32 = arith.constant 0 : i32
    %c0_i32_0 = arith.constant 0 : i32
    return %arg0, %c0_i32 : i32, i32
  }
  func.func @transform_1(%arg0: i32) -> (i32, i32) {
    %c0_i32 = arith.constant 0 : i32
    %c0_i32_0 = arith.constant 0 : i32
    %c0_i32_1 = arith.constant 0 : i32
    return %c0_i32, %c0_i32_0 : i32, i32
  }
  func.func @transform_2(%arg0: i32) -> (i32, i32) {
    %c0_i32 = arith.constant 0 : i32
    %c0_i32_0 = arith.constant 0 : i32
    %c0_i32_1 = arith.constant 0 : i32
    return %c0_i32, %c0_i32_0 : i32, i32
  }
  func.func @transform_3(%arg0: i32) -> (i32, i32) {
    %c0_i32 = arith.constant 0 : i32
    %c0_i32_0 = arith.constant 0 : i32
    %c0_i32_1 = arith.constant 0 : i32
    return %c0_i32, %c0_i32_0 : i32, i32
  }
  func.func @transform_4(%arg0: i32) -> (i32, i32) {
    %c0_i32 = arith.constant 0 : i32
    %c0_i32_0 = arith.constant 0 : i32
    %c0_i32_1 = arith.constant 0 : i32
    return %c0_i32, %c0_i32_0 : i32, i32
  }
  func.func @transform_5(%arg0: i32) -> (i32, i32) {
    %c0_i32 = arith.constant 0 : i32
    %c0_i32_0 = arith.constant 0 : i32
    %c0_i32_1 = arith.constant 0 : i32
    return %c0_i32, %c0_i32_0 : i32, i32
  }
  func.func @transform_6(%arg0: i32) -> (i32, i32) {
    %c0_i32 = arith.constant 0 : i32
    %c0_i32_0 = arith.constant 0 : i32
    %c0_i32_1 = arith.constant 0 : i32
    return %c0_i32, %c0_i32_0 : i32, i32
  }
  func.func @transform_7(%arg0: i32) -> (i32, i32) {
    %c0_i32 = arith.constant 0 : i32
    %c0_i32_0 = arith.constant 0 : i32
    return %arg0, %c0_i32 : i32, i32
  }
}

</mosaic_0001>

<bundles_post_ra>
// kernel: generic_network_forward.1
= control target key start
LH: loop header
LB: loop body
LE: loop exit
PB: predicated region body
PF: predicated region fallthrough
CT: control target
= control target key end

     0   :  { %vm67_vm0 = vcmask 64512   ;;  %v469_v0 = vmov 0.0   ;;  %vm470_vm1 = vmmov 0   ;;  %v471_v4 = vmov 0.0|0.0   ;;  %s642_s1 = inlined_call_operand.vmem [shape: f32[8,128], index: 1, kind: input, shape index: {}]   ;;  %s643_s0 = inlined_call_operand.vmem [shape: f32[8,8], index: 0, kind: input, shape index: {}]   ;;  %s644_s3 = inlined_call_operand.vmem [shape: f32[128,128], index: 3, kind: input, shape index: {}]   ;;  %s645_s5 = inlined_call_operand.vmem [shape: f32[128,4], index: 5, kind: input, shape index: {}]   ;;  %s646_s2 = inlined_call_operand.vmem [shape: f32[1,128], index: 2, kind: input, shape index: {}]   ;;  %s647_s4 = inlined_call_operand.vmem [shape: f32[1,128], index: 4, kind: input, shape index: {}]   ;;  %s648_s6 = inlined_call_operand.vmem [shape: f32[1,4], index: 6, kind: input, shape index: {}]   ;;  %s649_s7 = inlined_call_operand.vmem [shape: f32[8,4], index: 7, kind: output, shape index: {}]  }
   0x1   :  { %343 = vmatprep.subr.mxu0 %v469_v0  ;;  %v26_v1 = vld [vmem:[%s642_s1] sm:$0xff]  ;;  %345 = vmatprep.mubr.msk.f32.mxu0 %vm470_vm1, %v469_v0  ;;  %v28_v5 = vld [vmem:[%s644_s3 + $0x8] sm:$0xff]  ;;  %v29_v6 = vld [vmem:[%s644_s3 + $0x10] sm:$0xff]  ;;  %vm297_vm2 = vcmask 31744  }
   0x2   :  { %v59_v2 = vld [vmem:[%s643_s0] sm:$0xff]  ;;  %344 = vmatpush3.msra.mxu0 %v26_v1  ;;  %418 = vmatprep.subr.bf16.mxu1 %v471_v4  ;;  %v30_v7 = vld [vmem:[%s644_s3 + $0x18] sm:$0xff]  ;;  %v32_v11 = vld [vmem:[%s644_s3 + $0x28] sm:$0xff] }
   0x3   :  { %v27_v3 = vld [vmem:[%s644_s3] sm:$0xff]  ;;  %346 = vmatmul.mubr.msk.f32.vlgmr.msra.gmra.mrb[0].mxu0 %vm67_vm0, %v59_v2  ;;  %380 = vmatprep.mubr.msk.f32.mxu1 %vm470_vm1, %v469_v0  ;;  %v422_v9 = vpack.c.bf16 %v30_v7, %v29_v6  ;;  %v33_v13 = vld [vmem:[%s644_s3 + $0x30] sm:$0xff]  ;;  %v34_v14 = vld [vmem:[%s644_s3 + $0x38] sm:$0xff] }
   0x4   :  { %v419_v8 = vpack.c.bf16 %v28_v5, %v27_v3  ;;  %442 = vmatprep.subr.bf16.mxu0 %v471_v4  ;;  %415 = vmatprep.mubr.msk.f32.mxu0 %vm470_vm1, %v469_v0  ;;  %v31_v10 = vld [vmem:[%s644_s3 + $0x20] sm:$0xff]  ;;  %v428_v15 = vpack.c.bf16 %v34_v14, %v33_v13  ;;  %v36_v17 = vld [vmem:[%s644_s3 + $0x48] sm:$0xff]  ;;  %v37_v19 = vld [vmem:[%s644_s3 + $0x50] sm:$0xff] }
   0x5   :  { %v425_v12 = vpack.c.bf16 %v32_v11, %v31_v10  ;;  %v35_v16 = vld [vmem:[%s644_s3 + $0x40] sm:$0xff]  ;;  %v38_v20 = vld [vmem:[%s644_s3 + $0x58] sm:$0xff]  ;;  %v40_v23 = vld [vmem:[%s644_s3 + $0x68] sm:$0xff] }
   0x6   :  { %420 = vmatpush3.bf16.msra.mxu1 %v419_v8  ;;  %v431_v18 = vpack.c.bf16 %v36_v17, %v35_v16  ;;  %v434_v21 = vpack.c.bf16 %v38_v20, %v37_v19  ;;  %v39_v22 = vld [vmem:[%s644_s3 + $0x60] sm:$0xff]  ;;  %v41_v25 = vld [vmem:[%s644_s3 + $0x70] sm:$0xff]  ;;  %v42_v26 = vld [vmem:[%s644_s3 + $0x78] sm:$0xff] }
   0x7   :  { %421 = vmatprep.subr.bf16.mxu1 %v471_v4  ;;  %v437_v24 = vpack.c.bf16 %v40_v23, %v39_v22  ;;  %v440_v27 = vpack.c.bf16 %v42_v26, %v41_v25  ;;  %v43_v28 = vld [vmem:[%s645_s5] sm:$0xff]  ;;  %v44_v29 = vld [vmem:[%s645_s5 + $0x8] sm:$0xff]  ;;  %v45_v30 = vld [vmem:[%s645_s5 + $0x10] sm:$0xff] }
   0x8   :  { %v443_v31 = vpack.c.bf16 %v44_v29, %v43_v28  ;;  %v46_v32 = vld [vmem:[%s645_s5 + $0x18] sm:$0xff]  ;;  %v47_v34 = vld [vmem:[%s645_s5 + $0x20] sm:$0xff]  ;;  %v48_v35 = vld [vmem:[%s645_s5 + $0x28] sm:$0xff] }
   0x9   :  { %v446_v33 = vpack.c.bf16 %v46_v32, %v45_v30  ;;  %v449_v36 = vpack.c.bf16 %v48_v35, %v47_v34  ;;  %v49_v37 = vld [vmem:[%s645_s5 + $0x30] sm:$0xff]  ;;  %v50_v38 = vld [vmem:[%s645_s5 + $0x38] sm:$0xff]  ;;  %v51_v40 = vld [vmem:[%s645_s5 + $0x40] sm:$0xff] }
   0xa   :  { %423 = vmatpush3.bf16.msra.mxu1 %v422_v9  ;;  %444 = vmatpush3.bf16.msra.mxu0 %v443_v31  ;;  %v452_v39 = vpack.c.bf16 %v50_v38, %v49_v37  ;;  %v52_v41 = vld [vmem:[%s645_s5 + $0x48] sm:$0xff]  ;;  %v53_v43 = vld [vmem:[%s645_s5 + $0x50] sm:$0xff]  ;;  %v54_v44 = vld [vmem:[%s645_s5 + $0x58] sm:$0xff] }
   0xb   :  { %424 = vmatprep.subr.bf16.mxu1 %v471_v4  ;;  %445 = vmatprep.subr.bf16.mxu0 %v471_v4  ;;  %v455_v42 = vpack.c.bf16 %v52_v41, %v51_v40  ;;  %v458_v45 = vpack.c.bf16 %v54_v44, %v53_v43  ;;  %v55_v46 = vld [vmem:[%s645_s5 + $0x60] sm:$0xff]  ;;  %v56_v47 = vld [vmem:[%s645_s5 + $0x68] sm:$0xff]  ;;  %v57_v54 = vld [vmem:[%s645_s5 + $0x70] sm:$0xff] }
   0xc   :  { %v461_v48 = vpack.c.bf16 %v56_v47, %v55_v46  ;;  %v303_v49 = vld [vmem:[%s646_s2] ss:$0 sm:$0xff]  ;;  %v58_v55 = vld [vmem:[%s645_s5 + $0x78] sm:$0xff] }
   0xd   :  { %v464_v56 = vpack.c.bf16 %v58_v55, %v57_v54  ;;  %v305_v57 = vld [vmem:[%s647_s4] ss:$0 sm:$0xff] }
   0xe   :  { %426 = vmatpush3.bf16.msra.mxu1 %v425_v12  ;;  %447 = vmatpush3.bf16.msra.mxu0 %v446_v33  ;;  %v306_v62 = vld [vmem:[%s648_s6] ss:$0 sm:$0xff] }
   0xf   :  { %427 = vmatprep.subr.bf16.mxu1 %v471_v4  ;;  %448 = vmatprep.subr.bf16.mxu0 %v471_v4 }
  0x12   :  { %429 = vmatpush3.bf16.msra.mxu1 %v428_v15  ;;  %450 = vmatpush3.bf16.msra.mxu0 %v449_v36 }
  0x13   :  { %430 = vmatprep.subr.bf16.mxu1 %v471_v4  ;;  %451 = vmatprep.subr.bf16.mxu0 %v471_v4 }
  0x16   :  { %432 = vmatpush3.bf16.msra.mxu1 %v431_v18  ;;  %453 = vmatpush3.bf16.msra.mxu0 %v452_v39 }
  0x17   :  { %433 = vmatprep.subr.bf16.mxu1 %v471_v4  ;;  %454 = vmatprep.subr.bf16.mxu0 %v471_v4 }
  0x1a   :  { %435 = vmatpush3.bf16.msra.mxu1 %v434_v21  ;;  %456 = vmatpush3.bf16.msra.mxu0 %v455_v42 }
  0x1b   :  { %436 = vmatprep.subr.bf16.mxu1 %v471_v4  ;;  %457 = vmatprep.subr.bf16.mxu0 %v471_v4 }
  0x1e   :  { %438 = vmatpush3.bf16.msra.mxu1 %v437_v24  ;;  %459 = vmatpush3.bf16.msra.mxu0 %v458_v45 }
  0x1f   :  { %439 = vmatprep.subr.bf16.mxu1 %v471_v4  ;;  %460 = vmatprep.subr.bf16.mxu0 %v471_v4 }
  0x22   :  { %441 = vmatpush3.bf16.msra.mxu1 %v440_v27  ;;  %462 = vmatpush3.bf16.msra.mxu0 %v461_v48 }
  0x23   :  { %463 = vmatprep.subr.bf16.mxu0 %v471_v4 }
  0x26   :  { %465 = vmatpush3.bf16.msra.mxu0 %v464_v56 }
  0xd6   :  { %v137_v50 = vpop.f32.mrb[0].mxu0 }
  0xd7   :  { %v138_v51 = vadd.f32 %v303_v49, %v137_v50  ;;  %v347_v52 = vpop.f32.mrb[1].mxu0 }
  0xd9   :  { %v141_v53 = vmax.f32 %v138_v51, 0.0 }
  0xdb   :  { %381 = vmatmul.mubr.f32.vlgmr.msra.gmra.mrb[0].mxu1 %v141_v53 }
 0x1ae   :  { %v215_v58 = vpop.f32.mrb[0].mxu1 }
 0x1af   :  { %v216_v59 = vadd.f32 %v305_v57, %v215_v58  ;;  %v382_v60 = vpop.f32.mrb[1].mxu1 }
 0x1b1   :  { %v219_v61 = vmax.f32 %v216_v59, 0.0 }
 0x1b3   :  { %416 = vmatmul.mubr.f32.vlgmr.msra.gmra.mrb[2].mxu0 %v219_v61 }
 0x286   :  { %v293_v63 = vpop.f32.mrb[2].mxu0 }
 0x287   :  { %v294_v0 = vadd.f32 %v306_v62, %v293_v63  ;;  %v417_v1 = vpop.f32.mrb[3].mxu0 }
 0x289   :  { %298 = vst.msk [vmem:[%s649_s7] sm:$0xff] %vm297_vm2, %v294_v0 }

</bundles_post_ra>
